<compile_context>
chip_gen: v7x
topology: tpu7x:2x2x1
jax: 0.10.0
libtpu: 0.0.40
codegen_flags: <defaults>
</compile_context>

<pallas_src>
import functools

import jax
import jax.numpy as jnp
from jax import lax
from jax.experimental import pallas as pl
from jax.experimental.pallas import tpu as pltpu

HIDDEN_SIZE = 16
SRC_VOCAB = {'<pad>': 0, '<sos>': 1, '<eos>': 2, 'I': 3, 'am': 4, 'a': 5, 'student': 6}
INPUT_SIZE = len(SRC_VOCAB)  # vocab size = 7

LANE = 128     # vreg lane width
SUBLANE = 8    # vreg sublane depth


def _round_up(x, m):
    return (x + m - 1) // m * m


def encoder_kernel(tok_ref, w_xg_ref, w_hh_ref, b_ref,
                   h_out_ref, c_out_ref,
                   xp_ref, *, hidden):
    """Whole encoder (fused embedding + input projection + LSTM recurrence).

    tok_ref : (S*Bp, 1)  int32  time-major token ids (padded batch rows hold a zero-row id)
    w_xg_ref: (Vp, 128)  f32    folded  E @ W_ih^T, gates i|f|g|o packed in lanes [0, 4H)
    w_hh_ref: (Hp, 128)  f32    hidden->gate weights, same packed-gate lane layout
    b_ref   : (1, 128)   f32    combined bias (b_ih + b_hh), packed-gate layout
    h_out_ref, c_out_ref: (Bp, Hp) f32 final hidden / cell state (padded; lanes >= H are junk)
    xp_ref  : (S, Bp, 128) f32 VMEM scratch: hoisted  onehot @ W_xg + b  for all steps
    """
    H = hidden
    SBp = tok_ref.shape[0]
    Vp = w_xg_ref.shape[0]
    Bp, Hp = h_out_ref.shape
    S = SBp // Bp

    # --- Fused embedding gather + input projection (one MXU matmul, all steps). ---
    col = lax.broadcasted_iota(jnp.int32, (SBp, Vp), 1)
    onehot = (col == tok_ref[...]).astype(jnp.float32)                    # (S*Bp, Vp)
    xp = jnp.dot(onehot, w_xg_ref[...],
                 preferred_element_type=jnp.float32) + b_ref[...]         # (S*Bp, 128)
    xp_ref[...] = xp.reshape(S, Bp, Hp)          # tile-aligned (Bp == SUBLANE) reshape

    # Hoisted per-lane gate-selection mask: lanes [2H,3H) are the tanh (candidate) gate.
    lane = lax.broadcasted_iota(jnp.int32, (Bp, Hp), 1)
    is_g_lane = (lane >= 2 * H) & (lane < 3 * H)

    # --- Serial recurrence: one (8,128)@(128,128) matmul + one tanh pass per step. ---
    def step(t, carry):
        h_prev, c_prev = carry
        gates = xp_ref[t] + jnp.dot(h_prev, w_hh_ref[...],
                                    preferred_element_type=jnp.float32)   # (Bp, 128)
        # sigmoid(x) = 0.5*(1 + tanh(x/2))  -> single EUP pass over the packed vreg,
        # then per-lane select between the tanh gate and the three sigmoid gates.
        pre = jnp.where(is_g_lane, gates, 0.5 * gates)
        t_act = jnp.tanh(pre)
        act = jnp.where(is_g_lane, t_act, 0.5 * (t_act + 1.0))            # (Bp, 128)
        # Realign f / g / o blocks onto lanes [0, H) with XLU rotates (i already there).
        i_g = act
        f_g = pltpu.roll(act, shift=Hp - H, axis=1)
        g_g = pltpu.roll(act, shift=Hp - 2 * H, axis=1)
        o_g = pltpu.roll(act, shift=Hp - 3 * H, axis=1)
        # Lanes >= H carry bounded junk; W_hh rows >= H are zero, and the wrapper
        # strips lanes >= H from the outputs, so it never contaminates the result.
        c_new = f_g * c_prev + i_g * g_g
        h_new = o_g * jnp.tanh(c_new)
        return h_new, c_new

    h0 = jnp.zeros((Bp, Hp), jnp.float32)
    c0 = jnp.zeros((Bp, Hp), jnp.float32)
    h_fin, c_fin = lax.fori_loop(0, S, step, (h0, c0), unroll=True)

    h_out_ref[...] = h_fin
    c_out_ref[...] = c_fin


def prepare_params(emb_table, w_ih, w_hh, b_ih, b_hh):
    """One-time packing (run OUTSIDE the jitted forward).

    Returns:
      w_xg  : (Vp, 128) f32 — folded  E @ W_ih^T, gates packed in lanes [0, 4H),
              rows >= V are zero (so any id >= V embeds to zero; Vp > V guaranteed).
      w_hh_p: (Hp, 128) f32 — W_hh^T with the same packed-gate layout, rows >= H zero.
      b_p   : (1, 128)  f32 — b_ih + b_hh in packed-gate layout.
    """
    V, H = emb_table.shape
    assert 4 * H <= LANE, "packed-gate layout requires 4*hidden <= 128"
    Vp = _round_up(max(V + 1, LANE), LANE)   # +1 guarantees a zero pad row exists
    Hp = _round_up(max(H, LANE), LANE)

    w_xg = jnp.zeros((Vp, LANE), jnp.float32).at[:V, :4 * H].set(
        emb_table.astype(jnp.float32) @ w_ih.T.astype(jnp.float32))
    w_hh_p = jnp.zeros((Hp, LANE), jnp.float32).at[:H, :4 * H].set(w_hh.T)
    b_p = jnp.zeros((1, LANE), jnp.float32).at[0, :4 * H].set(b_ih + b_hh)
    return w_xg, w_hh_p, b_p


@functools.partial(jax.jit, static_argnames=("hidden",))
def encoder_forward(tokens, w_xg, w_hh_p, b_p, *, hidden=HIDDEN_SIZE):
    """tokens: (batch, seq) int32. Returns (hidden, cell), each (1, batch, hidden)."""
    B, S = tokens.shape
    Vp = w_xg.shape[0]
    Hp = w_hh_p.shape[0]
    Bp = _round_up(max(B, SUBLANE), SUBLANE)

    # input.permute(1, 0) -> (seq, batch); pad batch rows with the guaranteed-zero
    # embedding row id (Vp - 1).  Tokens travel as a tiny (S*Bp, 1) column; the
    # lane broadcast / one-hot compare happens inside the kernel.
    pad_id = Vp - 1
    tok_tb = jnp.full((S, Bp), pad_id, jnp.int32).at[:, :B].set(tokens.T.astype(jnp.int32))
    tok_in = tok_tb.reshape(S * Bp, 1)

    out_shapes = (jax.ShapeDtypeStruct((Bp, Hp), jnp.float32),
                  jax.ShapeDtypeStruct((Bp, Hp), jnp.float32))

    kern = functools.partial(encoder_kernel, hidden=hidden)

    h_pad, c_pad = pl.pallas_call(
        kern,
        out_shape=out_shapes,
        grid_spec=pltpu.PrefetchScalarGridSpec(
            num_scalar_prefetch=0,
            grid=(1,),                                            # single invocation
            in_specs=[
                pl.BlockSpec((S * Bp, 1), lambda i: (0, 0)),      # token ids
                pl.BlockSpec((Vp, LANE), lambda i: (0, 0)),       # folded E @ W_ih^T
                pl.BlockSpec((Hp, LANE), lambda i: (0, 0)),       # W_hh (packed gates)
                pl.BlockSpec((1, LANE), lambda i: (0, 0)),        # bias
            ],
            out_specs=[
                pl.BlockSpec((Bp, Hp), lambda i: (0, 0)),         # hidden
                pl.BlockSpec((Bp, Hp), lambda i: (0, 0)),         # cell
            ],
            scratch_shapes=[
                pltpu.VMEM((S, Bp, LANE), jnp.float32),           # hoisted X@W_ih + b
            ],
        ),
        compiler_params=pltpu.CompilerParams(
            dimension_semantics=("arbitrary",)),
    )(tok_in, w_xg, w_hh_p, b_p)

    # Strip padding; nn.LSTM returns (num_layers * num_directions, B, H) = (1, B, H).
    h = h_pad[:B, :hidden]
    c = c_pad[:B, :hidden]
    return h[None, :, :], c[None, :, :]


def init_params(key, input_size, hidden_size):
    """Deterministic parameter init mirroring the PyTorch module's shapes."""
    k_emb, k1, k2, k3, k4 = jax.random.split(key, 5)
    H = hidden_size
    bound = 1.0 / jnp.sqrt(jnp.float32(H))
    emb_table = jax.random.normal(k_emb, (input_size, H), jnp.float32)      # nn.Embedding
    w_ih = jax.random.uniform(k1, (4 * H, H), jnp.float32, -bound, bound)   # weight_ih_l0
    w_hh = jax.random.uniform(k2, (4 * H, H), jnp.float32, -bound, bound)   # weight_hh_l0
    b_ih = jax.random.uniform(k3, (4 * H,), jnp.float32, -bound, bound)     # bias_ih_l0
    b_hh = jax.random.uniform(k4, (4 * H,), jnp.float32, -bound, bound)     # bias_hh_l0
    return emb_table, w_ih, w_hh, b_ih, b_hh


def lstm_reference(tokens, emb_table, w_ih, w_hh, b_ih, b_hh):
    """Pure-JAX reference of the same forward pass (for a correctness check)."""
    B, S = tokens.shape
    H = emb_table.shape[1]
    embedded = emb_table[tokens.T]  # (S, B, H)
    h = jnp.zeros((B, H), jnp.float32)
    c = jnp.zeros((B, H), jnp.float32)
    for t in range(S):
        gates = embedded[t] @ w_ih.T + h @ w_hh.T + b_ih + b_hh
        i_g = jax.nn.sigmoid(gates[:, 0 * H:1 * H])
        f_g = jax.nn.sigmoid(gates[:, 1 * H:2 * H])
        g_g = jnp.tanh(gates[:, 2 * H:3 * H])
        o_g = jax.nn.sigmoid(gates[:, 3 * H:4 * H])
        c = f_g * c + i_g * g_g
        h = o_g * jnp.tanh(c)
    return h[None], c[None]


if __name__ == "__main__":
    key = jax.random.PRNGKey(0)
    k_params, k_tokens = jax.random.split(key)

    batch, seq = 2, 8
    emb_table, w_ih, w_hh, b_ih, b_hh = init_params(k_params, INPUT_SIZE, HIDDEN_SIZE)
    tokens = jax.random.randint(k_tokens, (batch, seq), 0, INPUT_SIZE, dtype=jnp.int32)

    # One-time parameter folding / packing (hoisted out of the per-call forward path).
    w_xg, w_hh_p, b_p = prepare_params(emb_table, w_ih, w_hh, b_ih, b_hh)
    w_xg, w_hh_p, b_p = jax.block_until_ready((w_xg, w_hh_p, b_p))

    hidden, cell = encoder_forward(tokens, w_xg, w_hh_p, b_p, hidden=HIDDEN_SIZE)
    hidden, cell = jax.block_until_ready((hidden, cell))

    # Sanity check against pure-JAX reference (kernel computes sigmoid via the exact
    # tanh identity, so only transcendental-approximation-level differences remain).
    h_ref, c_ref = lstm_reference(tokens, emb_table, w_ih, w_hh, b_ih, b_hh)
    assert hidden.shape == (1, batch, HIDDEN_SIZE)
    assert cell.shape == (1, batch, HIDDEN_SIZE)
    assert jnp.allclose(hidden, h_ref, atol=1e-4), "hidden mismatch"
    assert jnp.allclose(cell, c_ref, atol=1e-4), "cell mismatch"

    print("KERNEL_OK")
</pallas_src>

<mosaic_0001>
module attributes {stable_mosaic.version = 11 : i64} {
  func.func @encoder_kernel(%arg0: i32, %arg1: memref<64x1xi32, #tpu.memory_space<vmem>>, %arg2: memref<128x128xf32, #tpu.memory_space<vmem>>, %arg3: memref<128x128xf32, #tpu.memory_space<vmem>>, %arg4: memref<1x128xf32, #tpu.memory_space<vmem>>, %arg5: memref<8x128xf32, #tpu.memory_space<vmem>>, %arg6: memref<8x128xf32, #tpu.memory_space<vmem>>, %arg7: memref<8x8x128xf32, #tpu.memory_space<vmem>>) attributes {dimension_semantics = [#tpu.dimension_semantics<arbitrary>], iteration_bounds = array<i64: 1>, scalar_prefetch = 0 : i64, scratch_operands = 1 : i64, tpu.core_type = #tpu.core_type<tc>, window_params = [{pipeline_mode = #tpu.pipeline_mode<synchronous>, transform_indices = @transform_0, window_bounds = array<i64: 64, 1>}, {pipeline_mode = #tpu.pipeline_mode<synchronous>, transform_indices = @transform_1, window_bounds = array<i64: 128, 128>}, {pipeline_mode = #tpu.pipeline_mode<synchronous>, transform_indices = @transform_2, window_bounds = array<i64: 128, 128>}, {pipeline_mode = #tpu.pipeline_mode<synchronous>, transform_indices = @transform_3, window_bounds = array<i64: 1, 128>}, {pipeline_mode = #tpu.pipeline_mode<synchronous>, transform_indices = @transform_4, window_bounds = array<i64: 8, 128>}, {pipeline_mode = #tpu.pipeline_mode<synchronous>, transform_indices = @transform_5, window_bounds = array<i64: 8, 128>}]} {
    %0 = tpu.iota {dimensions = array<i32: 1>} : vector<64x128xi32>
    %c0 = arith.constant 0 : index
    %c0_0 = arith.constant 0 : index
    %1 = vector.load %arg1[%c0, %c0_0] : memref<64x1xi32, #tpu.memory_space<vmem>>, vector<64x1xi32>
    %2 = vector.broadcast %1 : vector<64x1xi32> to vector<64x128xi32>
    %3 = arith.cmpi eq, %0, %2 : vector<64x128xi32>
    %4 = arith.extui %3 : vector<64x128xi1> to vector<64x128xi32>
    %5 = arith.sitofp %4 : vector<64x128xi32> to vector<64x128xf32>
    %c0_1 = arith.constant 0 : index
    %c0_2 = arith.constant 0 : index
    %6 = vector.load %arg2[%c0_1, %c0_2] : memref<128x128xf32, #tpu.memory_space<vmem>>, vector<128x128xf32>
    %cst = arith.constant dense<0.000000e+00> : vector<64x128xf32>
    %7 = tpu.matmul %5, %6, %cst {dimension_numbers = #tpu.dot_dimension_numbers<[1], [0], [0], [1], [0, 0, 1, 1], [], []>} : vector<64x128xf32>, vector<128x128xf32>, vector<64x128xf32> -> vector<64x128xf32>
    %c0_3 = arith.constant 0 : index
    %c0_4 = arith.constant 0 : index
    %8 = vector.load %arg4[%c0_3, %c0_4] : memref<1x128xf32, #tpu.memory_space<vmem>>, vector<1x128xf32>
    %9 = vector.broadcast %8 : vector<1x128xf32> to vector<64x128xf32>
    %10 = arith.addf %7, %9 : vector<64x128xf32>
    %11 = vector.shape_cast %10 : vector<64x128xf32> to vector<8x8x128xf32>
    %c0_5 = arith.constant 0 : index
    %c0_6 = arith.constant 0 : index
    %c0_7 = arith.constant 0 : index
    %12 = vector.load %arg7[%c0_5, %c0_6, %c0_7] : memref<8x8x128xf32, #tpu.memory_space<vmem>>, vector<8x8x128xf32>
    tpu.vector_store %arg7[%c0_5, %c0_6, %c0_7], %11 {strides = array<i32>} : memref<8x8x128xf32, #tpu.memory_space<vmem>>, vector<8x8x128xf32>,
    %13 = tpu.iota {dimensions = array<i32: 1>} : vector<8x128xi32>
    %c32_i32 = arith.constant 32 : i32
    %14 = vector.broadcast %c32_i32 : i32 to vector<8x128xi32>
    %15 = arith.cmpi sge, %13, %14 : vector<8x128xi32>
    %c48_i32 = arith.constant 48 : i32
    %16 = vector.broadcast %c48_i32 : i32 to vector<8x128xi32>
    %17 = arith.cmpi slt, %13, %16 : vector<8x128xi32>
    %18 = arith.andi %15, %17 : vector<8x128xi1>
    %cst_8 = arith.constant 0.000000e+00 : f32
    %19 = vector.broadcast %cst_8 : f32 to vector<8x128xf32>
    %cst_9 = arith.constant 0.000000e+00 : f32
    %20 = vector.broadcast %cst_9 : f32 to vector<8x128xf32>
    %c0_i32 = arith.constant 0 : i32
    %21 = arith.index_cast %c0_i32 : i32 to index
    %c0_10 = arith.constant 0 : index
    %c0_11 = arith.constant 0 : index
    %22 = vector.load %arg7[%21, %c0_10, %c0_11] : memref<8x8x128xf32, #tpu.memory_space<vmem>>, vector<1x8x128xf32>
    %23 = vector.shape_cast %22 : vector<1x8x128xf32> to vector<8x128xf32>
    %c0_12 = arith.constant 0 : index
    %c0_13 = arith.constant 0 : index
    %24 = vector.load %arg3[%c0_12, %c0_13] : memref<128x128xf32, #tpu.memory_space<vmem>>, vector<128x128xf32>
    %cst_14 = arith.constant dense<0.000000e+00> : vector<8x128xf32>
    %25 = tpu.matmul %19, %24, %cst_14 {dimension_numbers = #tpu.dot_dimension_numbers<[1], [0], [0], [1], [0, 0, 1, 1], [], []>} : vector<8x128xf32>, vector<128x128xf32>, vector<8x128xf32> -> vector<8x128xf32>
    %26 = arith.addf %23, %25 : vector<8x128xf32>
    %cst_15 = arith.constant 5.000000e-01 : f32
    %27 = vector.broadcast %cst_15 : f32 to vector<8x128xf32>
    %28 = arith.mulf %27, %26 : vector<8x128xf32>
    %29 = arith.select %18, %26, %28 : vector<8x128xi1>, vector<8x128xf32>
    %30 = math.tanh %29 : vector<8x128xf32>
    %cst_16 = arith.constant 1.000000e+00 : f32
    %31 = vector.broadcast %cst_16 : f32 to vector<8x128xf32>
    %32 = arith.addf %30, %31 : vector<8x128xf32>
    %cst_17 = arith.constant 5.000000e-01 : f32
    %33 = vector.broadcast %cst_17 : f32 to vector<8x128xf32>
    %34 = arith.mulf %33, %32 : vector<8x128xf32>
    %35 = arith.select %18, %30, %34 : vector<8x128xi1>, vector<8x128xf32>
    %c112_i32 = arith.constant 112 : i32
    %36 = tpu.dynamic_rotate %35 by %c112_i32 dim 1 : vector<8x128xf32>, i32 -> vector<8x128xf32>
    %c96_i32 = arith.constant 96 : i32
    %37 = tpu.dynamic_rotate %35 by %c96_i32 dim 1 : vector<8x128xf32>, i32 -> vector<8x128xf32>
    %c80_i32 = arith.constant 80 : i32
    %38 = tpu.dynamic_rotate %35 by %c80_i32 dim 1 : vector<8x128xf32>, i32 -> vector<8x128xf32>
    %39 = arith.mulf %36, %20 : vector<8x128xf32>
    %40 = arith.mulf %35, %37 : vector<8x128xf32>
    %41 = arith.addf %39, %40 : vector<8x128xf32>
    %42 = math.tanh %41 : vector<8x128xf32>
    %43 = arith.mulf %38, %42 : vector<8x128xf32>
    %c1_i32 = arith.constant 1 : i32
    %44 = arith.index_cast %c1_i32 : i32 to index
    %c0_18 = arith.constant 0 : index
    %c0_19 = arith.constant 0 : index
    %45 = vector.load %arg7[%44, %c0_18, %c0_19] : memref<8x8x128xf32, #tpu.memory_space<vmem>>, vector<1x8x128xf32>
    %46 = vector.shape_cast %45 : vector<1x8x128xf32> to vector<8x128xf32>
    %c0_20 = arith.constant 0 : index
    %c0_21 = arith.constant 0 : index
    %47 = vector.load %arg3[%c0_20, %c0_21] : memref<128x128xf32, #tpu.memory_space<vmem>>, vector<128x128xf32>
    %cst_22 = arith.constant dense<0.000000e+00> : vector<8x128xf32>
    %48 = tpu.matmul %43, %47, %cst_22 {dimension_numbers = #tpu.dot_dimension_numbers<[1], [0], [0], [1], [0, 0, 1, 1], [], []>} : vector<8x128xf32>, vector<128x128xf32>, vector<8x128xf32> -> vector<8x128xf32>
    %49 = arith.addf %46, %48 : vector<8x128xf32>
    %cst_23 = arith.constant 5.000000e-01 : f32
    %50 = vector.broadcast %cst_23 : f32 to vector<8x128xf32>
    %51 = arith.mulf %50, %49 : vector<8x128xf32>
    %52 = arith.select %18, %49, %51 : vector<8x128xi1>, vector<8x128xf32>
    %53 = math.tanh %52 : vector<8x128xf32>
    %cst_24 = arith.constant 1.000000e+00 : f32
    %54 = vector.broadcast %cst_24 : f32 to vector<8x128xf32>
    %55 = arith.addf %53, %54 : vector<8x128xf32>
    %cst_25 = arith.constant 5.000000e-01 : f32
    %56 = vector.broadcast %cst_25 : f32 to vector<8x128xf32>
    %57 = arith.mulf %56, %55 : vector<8x128xf32>
    %58 = arith.select %18, %53, %57 : vector<8x128xi1>, vector<8x128xf32>
    %c112_i32_26 = arith.constant 112 : i32
    %59 = tpu.dynamic_rotate %58 by %c112_i32_26 dim 1 : vector<8x128xf32>, i32 -> vector<8x128xf32>
    %c96_i32_27 = arith.constant 96 : i32
    %60 = tpu.dynamic_rotate %58 by %c96_i32_27 dim 1 : vector<8x128xf32>, i32 -> vector<8x128xf32>
    %c80_i32_28 = arith.constant 80 : i32
    %61 = tpu.dynamic_rotate %58 by %c80_i32_28 dim 1 : vector<8x128xf32>, i32 -> vector<8x128xf32>
    %62 = arith.mulf %59, %41 : vector<8x128xf32>
    %63 = arith.mulf %58, %60 : vector<8x128xf32>
    %64 = arith.addf %62, %63 : vector<8x128xf32>
    %65 = math.tanh %64 : vector<8x128xf32>
    %66 = arith.mulf %61, %65 : vector<8x128xf32>
    %c2_i32 = arith.constant 2 : i32
    %67 = arith.index_cast %c2_i32 : i32 to index
    %c0_29 = arith.constant 0 : index
    %c0_30 = arith.constant 0 : index
    %68 = vector.load %arg7[%67, %c0_29, %c0_30] : memref<8x8x128xf32, #tpu.memory_space<vmem>>, vector<1x8x128xf32>
    %69 = vector.shape_cast %68 : vector<1x8x128xf32> to vector<8x128xf32>
    %c0_31 = arith.constant 0 : index
    %c0_32 = arith.constant 0 : index
    %70 = vector.load %arg3[%c0_31, %c0_32] : memref<128x128xf32, #tpu.memory_space<vmem>>, vector<128x128xf32>
    %cst_33 = arith.constant dense<0.000000e+00> : vector<8x128xf32>
    %71 = tpu.matmul %66, %70, %cst_33 {dimension_numbers = #tpu.dot_dimension_numbers<[1], [0], [0], [1], [0, 0, 1, 1], [], []>} : vector<8x128xf32>, vector<128x128xf32>, vector<8x128xf32> -> vector<8x128xf32>
    %72 = arith.addf %69, %71 : vector<8x128xf32>
    %cst_34 = arith.constant 5.000000e-01 : f32
    %73 = vector.broadcast %cst_34 : f32 to vector<8x128xf32>
    %74 = arith.mulf %73, %72 : vector<8x128xf32>
    %75 = arith.select %18, %72, %74 : vector<8x128xi1>, vector<8x128xf32>
    %76 = math.tanh %75 : vector<8x128xf32>
    %cst_35 = arith.constant 1.000000e+00 : f32
    %77 = vector.broadcast %cst_35 : f32 to vector<8x128xf32>
    %78 = arith.addf %76, %77 : vector<8x128xf32>
    %cst_36 = arith.constant 5.000000e-01 : f32
    %79 = vector.broadcast %cst_36 : f32 to vector<8x128xf32>
    %80 = arith.mulf %79, %78 : vector<8x128xf32>
    %81 = arith.select %18, %76, %80 : vector<8x128xi1>, vector<8x128xf32>
    %c112_i32_37 = arith.constant 112 : i32
    %82 = tpu.dynamic_rotate %81 by %c112_i32_37 dim 1 : vector<8x128xf32>, i32 -> vector<8x128xf32>
    %c96_i32_38 = arith.constant 96 : i32
    %83 = tpu.dynamic_rotate %81 by %c96_i32_38 dim 1 : vector<8x128xf32>, i32 -> vector<8x128xf32>
    %c80_i32_39 = arith.constant 80 : i32
    %84 = tpu.dynamic_rotate %81 by %c80_i32_39 dim 1 : vector<8x128xf32>, i32 -> vector<8x128xf32>
    %85 = arith.mulf %82, %64 : vector<8x128xf32>
    %86 = arith.mulf %81, %83 : vector<8x128xf32>
    %87 = arith.addf %85, %86 : vector<8x128xf32>
    %88 = math.tanh %87 : vector<8x128xf32>
    %89 = arith.mulf %84, %88 : vector<8x128xf32>
    %c3_i32 = arith.constant 3 : i32
    %90 = arith.index_cast %c3_i32 : i32 to index
    %c0_40 = arith.constant 0 : index
    %c0_41 = arith.constant 0 : index
    %91 = vector.load %arg7[%90, %c0_40, %c0_41] : memref<8x8x128xf32, #tpu.memory_space<vmem>>, vector<1x8x128xf32>
    %92 = vector.shape_cast %91 : vector<1x8x128xf32> to vector<8x128xf32>
    %c0_42 = arith.constant 0 : index
    %c0_43 = arith.constant 0 : index
    %93 = vector.load %arg3[%c0_42, %c0_43] : memref<128x128xf32, #tpu.memory_space<vmem>>, vector<128x128xf32>
    %cst_44 = arith.constant dense<0.000000e+00> : vector<8x128xf32>
    %94 = tpu.matmul %89, %93, %cst_44 {dimension_numbers = #tpu.dot_dimension_numbers<[1], [0], [0], [1], [0, 0, 1, 1], [], []>} : vector<8x128xf32>, vector<128x128xf32>, vector<8x128xf32> -> vector<8x128xf32>
    %95 = arith.addf %92, %94 : vector<8x128xf32>
    %cst_45 = arith.constant 5.000000e-01 : f32
    %96 = vector.broadcast %cst_45 : f32 to vector<8x128xf32>
    %97 = arith.mulf %96, %95 : vector<8x128xf32>
    %98 = arith.select %18, %95, %97 : vector<8x128xi1>, vector<8x128xf32>
    %99 = math.tanh %98 : vector<8x128xf32>
    %cst_46 = arith.constant 1.000000e+00 : f32
    %100 = vector.broadcast %cst_46 : f32 to vector<8x128xf32>
    %101 = arith.addf %99, %100 : vector<8x128xf32>
    %cst_47 = arith.constant 5.000000e-01 : f32
    %102 = vector.broadcast %cst_47 : f32 to vector<8x128xf32>
    %103 = arith.mulf %102, %101 : vector<8x128xf32>
    %104 = arith.select %18, %99, %103 : vector<8x128xi1>, vector<8x128xf32>
    %c112_i32_48 = arith.constant 112 : i32
    %105 = tpu.dynamic_rotate %104 by %c112_i32_48 dim 1 : vector<8x128xf32>, i32 -> vector<8x128xf32>
    %c96_i32_49 = arith.constant 96 : i32
    %106 = tpu.dynamic_rotate %104 by %c96_i32_49 dim 1 : vector<8x128xf32>, i32 -> vector<8x128xf32>
    %c80_i32_50 = arith.constant 80 : i32
    %107 = tpu.dynamic_rotate %104 by %c80_i32_50 dim 1 : vector<8x128xf32>, i32 -> vector<8x128xf32>
    %108 = arith.mulf %105, %87 : vector<8x128xf32>
    %109 = arith.mulf %104, %106 : vector<8x128xf32>
    %110 = arith.addf %108, %109 : vector<8x128xf32>
    %111 = math.tanh %110 : vector<8x128xf32>
    %112 = arith.mulf %107, %111 : vector<8x128xf32>
    %c4_i32 = arith.constant 4 : i32
    %113 = arith.index_cast %c4_i32 : i32 to index
    %c0_51 = arith.constant 0 : index
    %c0_52 = arith.constant 0 : index
    %114 = vector.load %arg7[%113, %c0_51, %c0_52] : memref<8x8x128xf32, #tpu.memory_space<vmem>>, vector<1x8x128xf32>
    %115 = vector.shape_cast %114 : vector<1x8x128xf32> to vector<8x128xf32>
    %c0_53 = arith.constant 0 : index
    %c0_54 = arith.constant 0 : index
    %116 = vector.load %arg3[%c0_53, %c0_54] : memref<128x128xf32, #tpu.memory_space<vmem>>, vector<128x128xf32>
    %cst_55 = arith.constant dense<0.000000e+00> : vector<8x128xf32>
    %117 = tpu.matmul %112, %116, %cst_55 {dimension_numbers = #tpu.dot_dimension_numbers<[1], [0], [0], [1], [0, 0, 1, 1], [], []>} : vector<8x128xf32>, vector<128x128xf32>, vector<8x128xf32> -> vector<8x128xf32>
    %118 = arith.addf %115, %117 : vector<8x128xf32>
    %cst_56 = arith.constant 5.000000e-01 : f32
    %119 = vector.broadcast %cst_56 : f32 to vector<8x128xf32>
    %120 = arith.mulf %119, %118 : vector<8x128xf32>
    %121 = arith.select %18, %118, %120 : vector<8x128xi1>, vector<8x128xf32>
    %122 = math.tanh %121 : vector<8x128xf32>
    %cst_57 = arith.constant 1.000000e+00 : f32
    %123 = vector.broadcast %cst_57 : f32 to vector<8x128xf32>
    %124 = arith.addf %122, %123 : vector<8x128xf32>
    %cst_58 = arith.constant 5.000000e-01 : f32
    %125 = vector.broadcast %cst_58 : f32 to vector<8x128xf32>
    %126 = arith.mulf %125, %124 : vector<8x128xf32>
    %127 = arith.select %18, %122, %126 : vector<8x128xi1>, vector<8x128xf32>
    %c112_i32_59 = arith.constant 112 : i32
    %128 = tpu.dynamic_rotate %127 by %c112_i32_59 dim 1 : vector<8x128xf32>, i32 -> vector<8x128xf32>
    %c96_i32_60 = arith.constant 96 : i32
    %129 = tpu.dynamic_rotate %127 by %c96_i32_60 dim 1 : vector<8x128xf32>, i32 -> vector<8x128xf32>
    %c80_i32_61 = arith.constant 80 : i32
    %130 = tpu.dynamic_rotate %127 by %c80_i32_61 dim 1 : vector<8x128xf32>, i32 -> vector<8x128xf32>
    %131 = arith.mulf %128, %110 : vector<8x128xf32>
    %132 = arith.mulf %127, %129 : vector<8x128xf32>
    %133 = arith.addf %131, %132 : vector<8x128xf32>
    %134 = math.tanh %133 : vector<8x128xf32>
    %135 = arith.mulf %130, %134 : vector<8x128xf32>
    %c5_i32 = arith.constant 5 : i32
    %136 = arith.index_cast %c5_i32 : i32 to index
    %c0_62 = arith.constant 0 : index
    %c0_63 = arith.constant 0 : index
    %137 = vector.load %arg7[%136, %c0_62, %c0_63] : memref<8x8x128xf32, #tpu.memory_space<vmem>>, vector<1x8x128xf32>
    %138 = vector.shape_cast %137 : vector<1x8x128xf32> to vector<8x128xf32>
    %c0_64 = arith.constant 0 : index
    %c0_65 = arith.constant 0 : index
    %139 = vector.load %arg3[%c0_64, %c0_65] : memref<128x128xf32, #tpu.memory_space<vmem>>, vector<128x128xf32>
    %cst_66 = arith.constant dense<0.000000e+00> : vector<8x128xf32>
    %140 = tpu.matmul %135, %139, %cst_66 {dimension_numbers = #tpu.dot_dimension_numbers<[1], [0], [0], [1], [0, 0, 1, 1], [], []>} : vector<8x128xf32>, vector<128x128xf32>, vector<8x128xf32> -> vector<8x128xf32>
    %141 = arith.addf %138, %140 : vector<8x128xf32>
    %cst_67 = arith.constant 5.000000e-01 : f32
    %142 = vector.broadcast %cst_67 : f32 to vector<8x128xf32>
    %143 = arith.mulf %142, %141 : vector<8x128xf32>
    %144 = arith.select %18, %141, %143 : vector<8x128xi1>, vector<8x128xf32>
    %145 = math.tanh %144 : vector<8x128xf32>
    %cst_68 = arith.constant 1.000000e+00 : f32
    %146 = vector.broadcast %cst_68 : f32 to vector<8x128xf32>
    %147 = arith.addf %145, %146 : vector<8x128xf32>
    %cst_69 = arith.constant 5.000000e-01 : f32
    %148 = vector.broadcast %cst_69 : f32 to vector<8x128xf32>
    %149 = arith.mulf %148, %147 : vector<8x128xf32>
    %150 = arith.select %18, %145, %149 : vector<8x128xi1>, vector<8x128xf32>
    %c112_i32_70 = arith.constant 112 : i32
    %151 = tpu.dynamic_rotate %150 by %c112_i32_70 dim 1 : vector<8x128xf32>, i32 -> vector<8x128xf32>
    %c96_i32_71 = arith.constant 96 : i32
    %152 = tpu.dynamic_rotate %150 by %c96_i32_71 dim 1 : vector<8x128xf32>, i32 -> vector<8x128xf32>
    %c80_i32_72 = arith.constant 80 : i32
    %153 = tpu.dynamic_rotate %150 by %c80_i32_72 dim 1 : vector<8x128xf32>, i32 -> vector<8x128xf32>
    %154 = arith.mulf %151, %133 : vector<8x128xf32>
    %155 = arith.mulf %150, %152 : vector<8x128xf32>
    %156 = arith.addf %154, %155 : vector<8x128xf32>
    %157 = math.tanh %156 : vector<8x128xf32>
    %158 = arith.mulf %153, %157 : vector<8x128xf32>
    %c6_i32 = arith.constant 6 : i32
    %159 = arith.index_cast %c6_i32 : i32 to index
    %c0_73 = arith.constant 0 : index
    %c0_74 = arith.constant 0 : index
    %160 = vector.load %arg7[%159, %c0_73, %c0_74] : memref<8x8x128xf32, #tpu.memory_space<vmem>>, vector<1x8x128xf32>
    %161 = vector.shape_cast %160 : vector<1x8x128xf32> to vector<8x128xf32>
    %c0_75 = arith.constant 0 : index
    %c0_76 = arith.constant 0 : index
    %162 = vector.load %arg3[%c0_75, %c0_76] : memref<128x128xf32, #tpu.memory_space<vmem>>, vector<128x128xf32>
    %cst_77 = arith.constant dense<0.000000e+00> : vector<8x128xf32>
    %163 = tpu.matmul %158, %162, %cst_77 {dimension_numbers = #tpu.dot_dimension_numbers<[1], [0], [0], [1], [0, 0, 1, 1], [], []>} : vector<8x128xf32>, vector<128x128xf32>, vector<8x128xf32> -> vector<8x128xf32>
    %164 = arith.addf %161, %163 : vector<8x128xf32>
    %cst_78 = arith.constant 5.000000e-01 : f32
    %165 = vector.broadcast %cst_78 : f32 to vector<8x128xf32>
    %166 = arith.mulf %165, %164 : vector<8x128xf32>
    %167 = arith.select %18, %164, %166 : vector<8x128xi1>, vector<8x128xf32>
    %168 = math.tanh %167 : vector<8x128xf32>
    %cst_79 = arith.constant 1.000000e+00 : f32
    %169 = vector.broadcast %cst_79 : f32 to vector<8x128xf32>
    %170 = arith.addf %168, %169 : vector<8x128xf32>
    %cst_80 = arith.constant 5.000000e-01 : f32
    %171 = vector.broadcast %cst_80 : f32 to vector<8x128xf32>
    %172 = arith.mulf %171, %170 : vector<8x128xf32>
    %173 = arith.select %18, %168, %172 : vector<8x128xi1>, vector<8x128xf32>
    %c112_i32_81 = arith.constant 112 : i32
    %174 = tpu.dynamic_rotate %173 by %c112_i32_81 dim 1 : vector<8x128xf32>, i32 -> vector<8x128xf32>
    %c96_i32_82 = arith.constant 96 : i32
    %175 = tpu.dynamic_rotate %173 by %c96_i32_82 dim 1 : vector<8x128xf32>, i32 -> vector<8x128xf32>
    %c80_i32_83 = arith.constant 80 : i32
    %176 = tpu.dynamic_rotate %173 by %c80_i32_83 dim 1 : vector<8x128xf32>, i32 -> vector<8x128xf32>
    %177 = arith.mulf %174, %156 : vector<8x128xf32>
    %178 = arith.mulf %173, %175 : vector<8x128xf32>
    %179 = arith.addf %177, %178 : vector<8x128xf32>
    %180 = math.tanh %179 : vector<8x128xf32>
    %181 = arith.mulf %176, %180 : vector<8x128xf32>
    %c7_i32 = arith.constant 7 : i32
    %182 = arith.index_cast %c7_i32 : i32 to index
    %c0_84 = arith.constant 0 : index
    %c0_85 = arith.constant 0 : index
    %183 = vector.load %arg7[%182, %c0_84, %c0_85] : memref<8x8x128xf32, #tpu.memory_space<vmem>>, vector<1x8x128xf32>
    %184 = vector.shape_cast %183 : vector<1x8x128xf32> to vector<8x128xf32>
    %c0_86 = arith.constant 0 : index
    %c0_87 = arith.constant 0 : index
    %185 = vector.load %arg3[%c0_86, %c0_87] : memref<128x128xf32, #tpu.memory_space<vmem>>, vector<128x128xf32>
    %cst_88 = arith.constant dense<0.000000e+00> : vector<8x128xf32>
    %186 = tpu.matmul %181, %185, %cst_88 {dimension_numbers = #tpu.dot_dimension_numbers<[1], [0], [0], [1], [0, 0, 1, 1], [], []>} : vector<8x128xf32>, vector<128x128xf32>, vector<8x128xf32> -> vector<8x128xf32>
    %187 = arith.addf %184, %186 : vector<8x128xf32>
    %cst_89 = arith.constant 5.000000e-01 : f32
    %188 = vector.broadcast %cst_89 : f32 to vector<8x128xf32>
    %189 = arith.mulf %188, %187 : vector<8x128xf32>
    %190 = arith.select %18, %187, %189 : vector<8x128xi1>, vector<8x128xf32>
    %191 = math.tanh %190 : vector<8x128xf32>
    %cst_90 = arith.constant 1.000000e+00 : f32
    %192 = vector.broadcast %cst_90 : f32 to vector<8x128xf32>
    %193 = arith.addf %191, %192 : vector<8x128xf32>
    %cst_91 = arith.constant 5.000000e-01 : f32
    %194 = vector.broadcast %cst_91 : f32 to vector<8x128xf32>
    %195 = arith.mulf %194, %193 : vector<8x128xf32>
    %196 = arith.select %18, %191, %195 : vector<8x128xi1>, vector<8x128xf32>
    %c112_i32_92 = arith.constant 112 : i32
    %197 = tpu.dynamic_rotate %196 by %c112_i32_92 dim 1 : vector<8x128xf32>, i32 -> vector<8x128xf32>
    %c96_i32_93 = arith.constant 96 : i32
    %198 = tpu.dynamic_rotate %196 by %c96_i32_93 dim 1 : vector<8x128xf32>, i32 -> vector<8x128xf32>
    %c80_i32_94 = arith.constant 80 : i32
    %199 = tpu.dynamic_rotate %196 by %c80_i32_94 dim 1 : vector<8x128xf32>, i32 -> vector<8x128xf32>
    %200 = arith.mulf %197, %179 : vector<8x128xf32>
    %201 = arith.mulf %196, %198 : vector<8x128xf32>
    %202 = arith.addf %200, %201 : vector<8x128xf32>
    %203 = math.tanh %202 : vector<8x128xf32>
    %204 = arith.mulf %199, %203 : vector<8x128xf32>
    %c8_i32 = arith.constant 8 : i32
    %c0_95 = arith.constant 0 : index
    %c0_96 = arith.constant 0 : index
    %205 = vector.load %arg5[%c0_95, %c0_96] : memref<8x128xf32, #tpu.memory_space<vmem>>, vector<8x128xf32>
    tpu.vector_store %arg5[%c0_95, %c0_96], %204 {strides = array<i32>} : memref<8x128xf32, #tpu.memory_space<vmem>>, vector<8x128xf32>,
    %c0_97 = arith.constant 0 : index
    %c0_98 = arith.constant 0 : index
    %206 = vector.load %arg6[%c0_97, %c0_98] : memref<8x128xf32, #tpu.memory_space<vmem>>, vector<8x128xf32>
    tpu.vector_store %arg6[%c0_97, %c0_98], %202 {strides = array<i32>} : memref<8x128xf32, #tpu.memory_space<vmem>>, vector<8x128xf32>,
    return
  }
  func.func @transform_0(%arg0: i32) -> (i32, i32) {
    %c0_i32 = arith.constant 0 : i32
    %c0_i32_0 = arith.constant 0 : i32
    %c0_i32_1 = arith.constant 0 : i32
    return %c0_i32, %c0_i32_0 : i32, i32
  }
  func.func @transform_1(%arg0: i32) -> (i32, i32) {
    %c0_i32 = arith.constant 0 : i32
    %c0_i32_0 = arith.constant 0 : i32
    %c0_i32_1 = arith.constant 0 : i32
    return %c0_i32, %c0_i32_0 : i32, i32
  }
  func.func @transform_2(%arg0: i32) -> (i32, i32) {
    %c0_i32 = arith.constant 0 : i32
    %c0_i32_0 = arith.constant 0 : i32
    %c0_i32_1 = arith.constant 0 : i32
    return %c0_i32, %c0_i32_0 : i32, i32
  }
  func.func @transform_3(%arg0: i32) -> (i32, i32) {
    %c0_i32 = arith.constant 0 : i32
    %c0_i32_0 = arith.constant 0 : i32
    %c0_i32_1 = arith.constant 0 : i32
    return %c0_i32, %c0_i32_0 : i32, i32
  }
  func.func @transform_4(%arg0: i32) -> (i32, i32) {
    %c0_i32 = arith.constant 0 : i32
    %c0_i32_0 = arith.constant 0 : i32
    %c0_i32_1 = arith.constant 0 : i32
    return %c0_i32, %c0_i32_0 : i32, i32
  }
  func.func @transform_5(%arg0: i32) -> (i32, i32) {
    %c0_i32 = arith.constant 0 : i32
    %c0_i32_0 = arith.constant 0 : i32
    %c0_i32_1 = arith.constant 0 : i32
    return %c0_i32, %c0_i32_0 : i32, i32
  }
}

</mosaic_0001>

<bundles_post_ra>
// kernel: encoder_forward.1
= control target key start
LH: loop header
LB: loop body
LE: loop exit
PB: predicated region body
PF: predicated region fallthrough
CT: control target
= control target key end

     0   :  { %11 = vsyncpa [#allocation4], 0  ;;  %s2181_s0 = inlined_call_operand.vmem [shape: s32[64,1], index: 0, kind: input, shape index: {}]   ;;  %s2182_s1 = inlined_call_operand.hbm [shape: f32[128,128], index: 1, kind: input, shape index: {}]   ;;  %s2183_s2 = inlined_call_operand.hbm [shape: f32[128,128], index: 2, kind: input, shape index: {}]   ;;  %s2184_s3 = inlined_call_operand.vmem [shape: f32[1,128], index: 3, kind: input, shape index: {}]   ;;  %s2185_s4 = inlined_call_operand.vmem [shape: f32[8,128], index: 4, kind: output, shape index: {0}]   ;;  %s2186_s5 = inlined_call_operand.vmem [shape: f32[8,128], index: 5, kind: output, shape index: {1}]  }
   0x1   :  { %12 = vsyncpa [#allocation6], 0  ;;  %s1810_s18 = smov [#allocation3]   ;;  %s1762_s22 = scalar_lea.hbm %s2182_s1, 2048 }
   0x2   :  { %s20_s19 = sshll.u32 %s1810_s18, 4  ;;  %p1763_p0 = scmp.ne.s32.totalorder %s2182_s1, %s1762_s22  ;;  %s21_s19 = int_to_ptr.vmem [resolvable:$true] %s20_s19 }
   0x3   :  { %p1766_p1 = scmp.lt.u32.totalorder %s1762_s22, %s2182_s1 }
   0x5   :  { %p1768_p2 = pnand %p1766_p1, %p1763_p0 }
   0x7   :  { %1771 = shalt.err (!%p1768_p2)
}
   0x8   :  { %s1772_s27 = scalar_lea.vmem %s21_s19, 2048  ;;  %p1777_p4 = scmp.lt.s32.totalorder %s21_s19, %s21_s19 }
   0x9   :  { %p1773_p3 = scmp.ne.s32.totalorder %s21_s19, %s1772_s27  ;;  %p1778_p5 = scmp.lt.s32.totalorder %s1772_s27, %s1772_s27 }
   0xb   :  { %p1779_p6 = por %p1778_p5, %p1777_p4 }
   0xd   :  { %p1780_p7 = pnand %p1779_p6, %p1773_p3 }
   0xf   :  { %1783 = shalt.err (!%p1780_p7)
}
  0x10   :  { %s1811_s28 = smov 128   ;;  %s1812_s29 = smov 8  }
  0x11   :  { %26 = dma.hbm_to_vmem [thread:$0]  %s2182_s1, 2048, %s21_s19, [#allocation4], %s1811_s28, %s1811_s28, %s1812_s29  }
  0x12   :  { %s1813_s7 = smov [#allocation5]   ;;  %s1784_s11 = scalar_lea.hbm %s2183_s2, 2048 }
  0x13   :  { %s32_s8 = sshll.u32 %s1813_s7, 4  ;;  %p1785_p8 = scmp.ne.s32.totalorder %s2183_s2, %s1784_s11  ;;  %s33_s8 = int_to_ptr.vmem [resolvable:$true] %s32_s8 }
  0x14   :  { %p1788_p9 = scmp.lt.u32.totalorder %s1784_s11, %s2183_s2 }
  0x16   :  { %p1790_p10 = pnand %p1788_p9, %p1785_p8 }
  0x18   :  { %1793 = shalt.err (!%p1790_p10)
}
  0x19   :  { %s1794_s16 = scalar_lea.vmem %s33_s8, 2048  ;;  %p1799_p12 = scmp.lt.s32.totalorder %s33_s8, %s33_s8 }
  0x1a   :  { %p1795_p11 = scmp.ne.s32.totalorder %s33_s8, %s1794_s16  ;;  %p1800_p13 = scmp.lt.s32.totalorder %s1794_s16, %s1794_s16 }
  0x1c   :  { %p1801_p0 = por %p1800_p13, %p1799_p12 }
  0x1e   :  { %p1802_p1 = pnand %p1801_p0, %p1795_p11 }
  0x20   :  { %1805 = shalt.err (!%p1802_p1)
}
  0x21   :  { %38 = dma.hbm_to_vmem [thread:$0]  %s2183_s2, 2048, %s33_s8, [#allocation6], %s1811_s28, %s1811_s28, %s1812_s29  }
  0x22   :  { %1806 = dma.done.wait [#allocation4], 2048  }
  0x23   :  { %1807 = vsyncadd [#allocation4], 4294965248 }
  0x24   :  { %1808 = dma.done.wait [#allocation6], 2048  }
  0x25   :  { %1809 = vsyncadd [#allocation6], 4294965248  ;;  %v1814_v0 = vmov 0   ;;  %v1815_v1 = vmov 0.0|0.0   ;;  %v49_v2 = vld [vmem:[%s2181_s0] sm:$0xff]  ;;  %v51_v3 = vld [vmem:[%s2181_s0 + $0x10] sm:$0xff]  ;;  %v47_v56 = vlaneseq }
  0x26   :  { %1728 = vset.pattern.permute.xlu0 %v1814_v0  ;;  %1729 = vset.pattern.permute.xlu1 %v1814_v0  ;;  %v50_v4 = vld [vmem:[%s2181_s0 + $0x8] sm:$0xff]  ;;  %v52_v5 = vld [vmem:[%s2181_s0 + $0x18] sm:$0xff]  ;;  %v105_v6 = vld [vmem:[#allocation3] sm:$0xff]  ;;  %vm1816_vm0 = vmmov 0   ;;  %v1817_v24 = vmov 0.0   ;;  %v1818_v60 = vmov 1.0  }
  0x27   :  { %1524 = vmatprep.subr.bf16.mxu1 %v1815_v1  ;;  %58 = vperm.xlu0 %1728, %v49_v2   ;;  %v106_v7 = vld [vmem:[#allocation3 + $0x8] sm:$0xff]  ;;  %v245_v8 = vld [vmem:[#allocation5] sm:$0xff]  ;;  %v107_v12 = vld [vmem:[#allocation3 + $0x10] sm:$0xff]  ;;  %v1946_v57 = vand.u32 127, %v47_v56  ;;  %s1820_s29 = smov 112   ;;  %s1821_s11 = smov 80  }
  0x28   :  { %64 = vperm.xlu1 %1729, %v51_v3   ;;  %v246_v9 = vld [vmem:[#allocation5 + $0x8] sm:$0xff]  ;;  %v1492_v10 = vpack.c.bf16 %v106_v7, %v105_v6  ;;  %v108_v13 = vld [vmem:[#allocation3 + $0x18] sm:$0xff]  ;;  %v247_v14 = vld [vmem:[#allocation5 + $0x10] sm:$0xff]  ;;  %1244 = vmatprep.mubr.msk.f32.mxu1 %vm1816_vm0, %v1817_v24 }
  0x29   :  { %v1889_v11 = vpack.c.bf16 %v246_v9, %v245_v8  ;;  %v1496_v15 = vpack.c.bf16 %v108_v13, %v107_v12  ;;  %v248_v16 = vld [vmem:[#allocation5 + $0x18] sm:$0xff]  ;;  %v109_v17 = vld [vmem:[#allocation3 + $0x20] sm:$0xff]  ;;  %v110_v18 = vld [vmem:[#allocation3 + $0x28] sm:$0xff]  ;;  %vm241_vm6 = vcmp.ge.s32.totalorder %v1946_v57, 32  ;;  %vm242_vm7 = vcmp.lt.s32.totalorder %v1946_v57, 48 }
  0x2a   :  { %v53_v19 = vld [vmem:[%s2181_s0 + $0x20] sm:$0xff]  ;;  %1493 = vmatprep.subr.bf16.mxu0 %v1492_v10  ;;  %v1895_v20 = vpack.c.bf16 %v248_v16, %v247_v14  ;;  %v250_v22 = vld [vmem:[#allocation5 + $0x28] sm:$0xff]  ;;  %v1500_v23 = vpack.c.bf16 %v110_v18, %v109_v17  ;;  %v111_v25 = vld [vmem:[#allocation3 + $0x30] sm:$0xff] }
  0x2b   :  { %61 = vperm.xlu0 %1728, %v50_v4   ;;  %1526 = vmatpush3.bf16.msra.mxu1 %v1889_v11  ;;  %v249_v21 = vld [vmem:[#allocation5 + $0x20] sm:$0xff]  ;;  %v112_v26 = vld [vmem:[#allocation3 + $0x38] sm:$0xff]  ;;  %v251_v28 = vld [vmem:[#allocation5 + $0x30] sm:$0xff] }
  0x2c   :  { %67 = vperm.xlu1 %1729, %v52_v5   ;;  %1495 = vmatpush3.bf16.msra.mxu0 %v1492_v10  ;;  %v1901_v27 = vpack.c.bf16 %v250_v22, %v249_v21  ;;  %v252_v29 = vld [vmem:[#allocation5 + $0x38] sm:$0xff]  ;;  %v1504_v30 = vpack.c.bf16 %v112_v26, %v111_v25  ;;  %v113_v31 = vld [vmem:[#allocation3 + $0x40] sm:$0xff]  ;;  %v114_v32 = vld [vmem:[#allocation3 + $0x48] sm:$0xff] }
  0x2d   :  { %1527 = vmatprep.subr.bf16.mxu1 %v1815_v1  ;;  %1497 = vmatprep.subr.bf16.mxu0 %v1496_v15  ;;  %v1905_v33 = vpack.c.bf16 %v252_v29, %v251_v28  ;;  %v253_v34 = vld [vmem:[#allocation5 + $0x40] sm:$0xff]  ;;  %v254_v35 = vld [vmem:[#allocation5 + $0x48] sm:$0xff]  ;;  %v1508_v36 = vpack.c.bf16 %v114_v32, %v113_v31  ;;  %v115_v37 = vld [vmem:[#allocation3 + $0x50] sm:$0xff] }
  0x2e   :  { %v116_v38 = vld [vmem:[#allocation3 + $0x58] sm:$0xff]  ;;  %v1909_v39 = vpack.c.bf16 %v254_v35, %v253_v34  ;;  %v255_v40 = vld [vmem:[#allocation5 + $0x50] sm:$0xff]  ;;  %v117_v43 = vld [vmem:[#allocation3 + $0x60] sm:$0xff] }
  0x2f   :  { %70 = vperm.xlu0 %1728, %v53_v19   ;;  %1529 = vmatpush3.bf16.msra.mxu1 %v1895_v20  ;;  %v256_v41 = vld [vmem:[#allocation5 + $0x58] sm:$0xff]  ;;  %v1512_v42 = vpack.c.bf16 %v116_v38, %v115_v37  ;;  %v118_v44 = vld [vmem:[#allocation3 + $0x68] sm:$0xff]  ;;  %v257_v46 = vld [vmem:[#allocation5 + $0x60] sm:$0xff] }
  0x30   :  { %1499 = vmatpush3.bf16.msra.mxu0 %v1496_v15  ;;  %1530 = vmatprep.subr.bf16.mxu1 %v1815_v1  ;;  %v1913_v45 = vpack.c.bf16 %v256_v41, %v255_v40  ;;  %v258_v47 = vld [vmem:[#allocation5 + $0x68] sm:$0xff]  ;;  %v1516_v48 = vpack.c.bf16 %v118_v44, %v117_v43  ;;  %v119_v49 = vld [vmem:[#allocation3 + $0x70] sm:$0xff]  ;;  %v120_v50 = vld [vmem:[#allocation3 + $0x78] sm:$0xff] }
  0x31   :  { %1501 = vmatprep.subr.bf16.mxu0 %v1500_v23  ;;  %v1917_v51 = vpack.c.bf16 %v258_v47, %v257_v46  ;;  %v259_v52 = vld [vmem:[#allocation5 + $0x70] sm:$0xff]  ;;  %v260_v53 = vld [vmem:[#allocation5 + $0x78] sm:$0xff]  ;;  %v1520_v54 = vpack.c.bf16 %v120_v50, %v119_v49  ;;  %v1977_v3 = vld [vmem:[%s2184_s3] ss:$0 sm:$0xff]  ;;  %s1819_s3 = smov 96  }
  0x32   :  { %v1921_v55 = vpack.c.bf16 %v260_v53, %v259_v52  ;;  %vm1984_vm8 = vmand %vm241_vm6, %vm242_vm7  ;;  %v55_v16 = vld [vmem:[%s2181_s0 + $0x30] sm:$0xff]  ;;  %v54_v17 = vld [vmem:[%s2181_s0 + $0x28] sm:$0xff] }
  0x33   :  { %1532 = vmatpush3.bf16.msra.mxu1 %v1901_v27  ;;  %v56_v18 = vld [vmem:[%s2181_s0 + $0x38] sm:$0xff] }
  0x34   :  { %1503 = vmatpush3.bf16.msra.mxu0 %v1500_v23  ;;  %1533 = vmatprep.subr.bf16.mxu1 %v1815_v1 }
  0x35   :  { %1505 = vmatprep.subr.bf16.mxu0 %v1504_v30 }
  0x37   :  { %1535 = vmatpush3.bf16.msra.mxu1 %v1905_v33 }
  0x38   :  { %1507 = vmatpush3.bf16.msra.mxu0 %v1504_v30  ;;  %1536 = vmatprep.subr.bf16.mxu1 %v1815_v1 }
  0x39   :  { %1509 = vmatprep.subr.bf16.mxu0 %v1508_v36 }
  0x3b   :  { %1538 = vmatpush3.bf16.msra.mxu1 %v1909_v39 }
  0x3c   :  { %1511 = vmatpush3.bf16.msra.mxu0 %v1508_v36  ;;  %1539 = vmatprep.subr.bf16.mxu1 %v1815_v1 }
  0x3d   :  { %1513 = vmatprep.subr.bf16.mxu0 %v1512_v42 }
  0x3f   :  { %1541 = vmatpush3.bf16.msra.mxu1 %v1913_v45 }
  0x40   :  { %1515 = vmatpush3.bf16.msra.mxu0 %v1512_v42  ;;  %1542 = vmatprep.subr.bf16.mxu1 %v1815_v1 }
  0x41   :  { %1517 = vmatprep.subr.bf16.mxu0 %v1516_v48 }
  0x43   :  { %1544 = vmatpush3.bf16.msra.mxu1 %v1917_v51 }
  0x44   :  { %1519 = vmatpush3.bf16.msra.mxu0 %v1516_v48  ;;  %1545 = vmatprep.subr.bf16.mxu1 %v1815_v1 }
  0x45   :  { %1521 = vmatprep.subr.bf16.mxu0 %v1520_v54 }
  0x47   :  { %1547 = vmatpush3.bf16.msra.mxu1 %v1921_v55 }
  0x48   :  { %1523 = vmatpush3.bf16.msra.mxu0 %v1520_v54  ;;  %1572 = vmatprep.subr.bf16.mxu1 %v1815_v1 }
  0x49   :  { %1548 = vmatprep.subr.bf16.mxu0 %v1815_v1 }
  0x4a   :  { %1245 = vmatmul.mubr.f32.vlgmr.msra.gmra.mrb[0].mxu1 %v1817_v24 }
  0x4b   :  { %1574 = vmatpush3.bf16.msra.mxu1 %v1889_v11  ;;  %1314 = vmatprep.mubr.msk.f32.mxu1 %vm1816_vm0, %v1817_v24 }
  0x4c   :  { %1575 = vmatprep.subr.bf16.mxu1 %v1815_v1 }
  0x4f   :  { %1577 = vmatpush3.bf16.msra.mxu1 %v1895_v20 }
  0x50   :  { %1578 = vmatprep.subr.bf16.mxu1 %v1815_v1 }
  0x53   :  { %1580 = vmatpush3.bf16.msra.mxu1 %v1901_v27 }
  0x54   :  { %1581 = vmatprep.subr.bf16.mxu1 %v1815_v1 }
  0x57   :  { %1583 = vmatpush3.bf16.msra.mxu1 %v1905_v33 }
  0x58   :  { %1584 = vmatprep.subr.bf16.mxu1 %v1815_v1 }
  0x5b   :  { %1586 = vmatpush3.bf16.msra.mxu1 %v1909_v39 }
  0x5c   :  { %1587 = vmatprep.subr.bf16.mxu1 %v1815_v1 }
  0x5f   :  { %1589 = vmatpush3.bf16.msra.mxu1 %v1913_v45 }
  0x60   :  { %1590 = vmatprep.subr.bf16.mxu1 %v1815_v1 }
  0x63   :  { %1592 = vmatpush3.bf16.msra.mxu1 %v1917_v51 }
  0x64   :  { %1593 = vmatprep.subr.bf16.mxu1 %v1815_v1 }
  0x67   :  { %1595 = vmatpush3.bf16.msra.mxu1 %v1921_v55 }
  0x68   :  { %1620 = vmatprep.subr.bf16.mxu1 %v1815_v1 }
  0xa6   :  { %v59_v58 = vpop.permute.xlu0 %58 }
  0xa7   :  { %v65_v59 = vpop.permute.xlu1 %64  ;;  %vm81_vm1 = vcmp.eq.s32.totalorder %v1946_v57, %v59_v58 }
  0xa8   :  { %1200 = vmatprep.mubr.msk.f32.mxu0 %vm81_vm1, %v1818_v60  ;;  %vm83_vm2 = vcmp.eq.s32.totalorder %v1946_v57, %v65_v59 }
  0xaa   :  { %v62_v61 = vpop.permute.xlu0 %61 }
  0xab   :  { %v68_v62 = vpop.permute.xlu1 %67  ;;  %vm82_vm3 = vcmp.eq.s32.totalorder %v1946_v57, %v62_v61 }
  0xac   :  { %1201 = vmatmul.mubr.msk.f32.vlgmr.msra.gmra.mrb[0].mxu0 %vm82_vm3, %v1818_v60  ;;  %vm84_vm4 = vcmp.eq.s32.totalorder %v1946_v57, %v68_v62 }
  0xad   :  { %1203 = vmatprep.mubr.msk.f32.mxu0 %vm83_vm2, %v1818_v60  ;;  %1550 = vmatpush3.bf16.msra.mxu0 %v1889_v11 }
  0xae   :  { %v71_v63 = vpop.permute.xlu0 %70  ;;  %1551 = vmatprep.subr.bf16.mxu0 %v1815_v1 }
  0xaf   :  { %vm85_vm5 = vcmp.eq.s32.totalorder %v1946_v57, %v71_v63 }
  0xb0   :  { %1204 = vmatmul.mubr.msk.f32.gmra.mrb[2].mxu0 %vm84_vm4, %v1818_v60 }
  0xb1   :  { %1206 = vmatprep.mubr.msk.f32.mxu0 %vm85_vm5, %v1818_v60  ;;  %1553 = vmatpush3.bf16.msra.mxu0 %v1895_v20 }
  0xb2   :  { %1554 = vmatprep.subr.bf16.mxu0 %v1815_v1 }
  0xb5   :  { %1556 = vmatpush3.bf16.msra.mxu0 %v1901_v27 }
  0xb6   :  { %1557 = vmatprep.subr.bf16.mxu0 %v1815_v1 }
  0xb9   :  { %1559 = vmatpush3.bf16.msra.mxu0 %v1905_v33 }
  0xba   :  { %1560 = vmatprep.subr.bf16.mxu0 %v1815_v1 }
  0xbd   :  { %1562 = vmatpush3.bf16.msra.mxu0 %v1909_v39 }
  0xbe   :  { %1563 = vmatprep.subr.bf16.mxu0 %v1815_v1 }
  0xc1   :  { %1565 = vmatpush3.bf16.msra.mxu0 %v1913_v45 }
  0xc2   :  { %1566 = vmatprep.subr.bf16.mxu0 %v1815_v1 }
  0xc5   :  { %1568 = vmatpush3.bf16.msra.mxu0 %v1917_v51 }
  0xc6   :  { %1569 = vmatprep.subr.bf16.mxu0 %v1815_v1 }
  0xc9   :  { %1571 = vmatpush3.bf16.msra.mxu0 %v1921_v55 }
  0xca   :  { %1596 = vmatprep.subr.bf16.mxu0 %v1815_v1 }
 0x11d   :  { %v327_v0 = vpop.f32.mrb[0].mxu1 }
 0x11e   :  { %v1246_v2 = vpop.f32.mrb[1].mxu1 }
 0x17f   :  { %v1979_v4 = vpop.f32.mrb[0].mxu0 }
 0x180   :  { %v194_v5 = vpop.f32.mrb[1].mxu0  ;;  %v200_v41 = vadd.f32 %v1979_v4, %v1977_v3 }
 0x181   :  { %v195_v6 = vadd.f32 %v1977_v3, %v194_v5 }
 0x183   :  { %v331_v7 = vadd.f32 %v327_v0, %v195_v6  ;;  %v2004_v19 = vpop.f32.mrb[2].mxu0 }
 0x184   :  { %v2006_v21 = vpop.f32.mrb[3].mxu0 }
 0x185   :  { %v332_v9 = vmul.f32 0.5, %v331_v7  ;;  %v205_v62 = vadd.f32 %v1977_v3, %v2006_v21 }
 0x187   :  { %v333_v10 = vsel %vm1984_vm8, %v331_v7, %v332_v9 }
 0x188   :  { %1730 = vtanh.f32 %v333_v10 }
 0x192   :  { %v1731_v12 = vpop.eup %1730 }
 0x193   :  { %v335_v13 = vadd.f32 1.0, %v1731_v12 }
 0x195   :  { %v336_v14 = vmul.f32 0.5, %v335_v13 }
 0x197   :  { %v337_v15 = vsel %vm1984_vm8, %v1731_v12, %v336_v14 }
 0x198   :  { %340 = vrot.lane.b32.xlu0 %v337_v15, %s1819_s3  ;;  %338 = vrot.lane.b32.xlu1 %v337_v15, %s1820_s29 }
 0x19c   :  { %76 = vperm.xlu0 %1728, %v55_v16   ;;  %73 = vperm.xlu1 %1729, %v54_v17  }
 0x1a0   :  { %342 = vrot.lane.b32.xlu0 %v337_v15, %s1821_s11  ;;  %79 = vperm.xlu1 %1729, %v56_v18  }
 0x20a   :  { %v339_v22 = vpop.permute.xlu1 %338  ;;  %v341_v23 = vpop.permute.xlu0 %340 }
 0x20b   :  { %v344_v25 = vmul.f32 0.0, %v339_v22  ;;  %v345_v26 = vmul.f32 %v341_v23, %v337_v15  ;;  %v210_v22 = vadd.f32 %v2004_v19, %v1977_v3 }
 0x20d   :  { %v346_v28 = vadd.f32 %v345_v26, %v344_v25 }
 0x20f   :  { %1732 = vtanh.f32 %v346_v28 }
 0x219   :  { %v1733_v34 = vpop.eup %1732 }
 0x21b   :  { %v74_v29 = vpop.permute.xlu1 %73  ;;  %v77_v30 = vpop.permute.xlu0 %76 }
 0x21c   :  { %vm86_vm9 = vcmp.eq.s32.totalorder %v1946_v57, %v74_v29  ;;  %vm87_vm10 = vcmp.eq.s32.totalorder %v1946_v57, %v77_v30 }
 0x21d   :  { %1207 = vmatmul.mubr.msk.f32.gmra.mrb[4].mxu0 %vm86_vm9, %v1818_v60 }
 0x21e   :  { %1209 = vmatprep.mubr.msk.f32.mxu0 %vm87_vm10, %v1818_v60 }
 0x21f   :  { %v80_v31 = vpop.permute.xlu1 %79  ;;  %v343_v32 = vpop.permute.xlu0 %342 }
 0x220   :  { %vm88_vm11 = vcmp.eq.s32.totalorder %v1946_v57, %v80_v31  ;;  %v348_v35 = vmul.f32 %v1733_v34, %v343_v32 }
 0x221   :  { %1210 = vmatmul.mubr.msk.f32.gmra.mrb[6].mxu0 %vm88_vm11, %v1818_v60 }
 0x222   :  { %1279 = vmatprep.mubr.msk.f32.mxu0 %vm1816_vm0, %v1817_v24 }
 0x225   :  { %1280 = vmatmul.mubr.f32.vlgmr.msra.gmra.mrb[8].mxu0 %v348_v35 }
 0x226   :  { %1598 = vmatpush3.bf16.msra.mxu0 %v1889_v11  ;;  %1349 = vmatprep.mubr.msk.f32.mxu0 %vm1816_vm0, %v1817_v24 }
 0x227   :  { %1599 = vmatprep.subr.bf16.mxu0 %v1815_v1 }
 0x22a   :  { %1601 = vmatpush3.bf16.msra.mxu0 %v1895_v20 }
 0x22b   :  { %1602 = vmatprep.subr.bf16.mxu0 %v1815_v1 }
 0x22e   :  { %1604 = vmatpush3.bf16.msra.mxu0 %v1901_v27 }
 0x22f   :  { %1605 = vmatprep.subr.bf16.mxu0 %v1815_v1 }
 0x232   :  { %1607 = vmatpush3.bf16.msra.mxu0 %v1905_v33 }
 0x233   :  { %1608 = vmatprep.subr.bf16.mxu0 %v1815_v1 }
 0x236   :  { %1610 = vmatpush3.bf16.msra.mxu0 %v1909_v39 }
 0x237   :  { %1611 = vmatprep.subr.bf16.mxu0 %v1815_v1 }
 0x23a   :  { %1613 = vmatpush3.bf16.msra.mxu0 %v1913_v45 }
 0x23b   :  { %1614 = vmatprep.subr.bf16.mxu0 %v1815_v1 }
 0x23e   :  { %1616 = vmatpush3.bf16.msra.mxu0 %v1917_v51 }
 0x23f   :  { %1617 = vmatprep.subr.bf16.mxu0 %v1815_v1 }
 0x242   :  { %1619 = vmatpush3.bf16.msra.mxu0 %v1921_v55 }
 0x243   :  { %1644 = vmatprep.subr.bf16.mxu0 %v1815_v1 }
 0x2f0   :  { %v2034_v36 = vpop.f32.mrb[4].mxu0 }
 0x2f1   :  { %v2036_v37 = vpop.f32.mrb[5].mxu0 }
 0x2f4   :  { %v2038_v38 = vpop.f32.mrb[6].mxu0 }
 0x2f5   :  { %v2040_v40 = vpop.f32.mrb[7].mxu0 }
 0x2f8   :  { %v417_v42 = vpop.f32.mrb[8].mxu0 }
 0x2f9   :  { %v421_v43 = vadd.f32 %v417_v42, %v200_v41  ;;  %v1281_v44 = vpop.f32.mrb[9].mxu0 }
 0x2fb   :  { %v422_v46 = vmul.f32 0.5, %v421_v43 }
 0x2fd   :  { %v423_v47 = vsel %vm1984_vm8, %v421_v43, %v422_v46 }
 0x2fe   :  { %1734 = vtanh.f32 %v423_v47 }
 0x308   :  { %v1735_v48 = vpop.eup %1734 }
 0x309   :  { %v425_v49 = vadd.f32 1.0, %v1735_v48 }
 0x30b   :  { %v426_v50 = vmul.f32 0.5, %v425_v49 }
 0x30d   :  { %v427_v52 = vsel %vm1984_vm8, %v1735_v48, %v426_v50  ;;  %v215_v48 = vadd.f32 %v1977_v3, %v2036_v37 }
 0x30e   :  { %430 = vrot.lane.b32.xlu0 %v427_v52, %s1819_s3  ;;  %428 = vrot.lane.b32.xlu1 %v427_v52, %s1820_s29 }
 0x312   :  { %432 = vrot.lane.b32.xlu1 %v427_v52, %s1821_s11 }
 0x380   :  { %v431_v53 = vpop.permute.xlu0 %430  ;;  %v429_v54 = vpop.permute.xlu1 %428 }
 0x381   :  { %v435_v56 = vmul.f32 %v431_v53, %v427_v52  ;;  %v434_v57 = vmul.f32 %v429_v54, %v346_v28 }
 0x383   :  { %v436_v58 = vadd.f32 %v435_v56, %v434_v57 }
 0x384   :  { %v433_v60 = vpop.permute.xlu1 %432 }
 0x385   :  { %1736 = vtanh.f32 %v436_v58 }
 0x38f   :  { %v1737_v59 = vpop.eup %1736 }
 0x390   :  { %v438_v61 = vmul.f32 %v1737_v59, %v433_v60 }
 0x392   :  { %1315 = vmatmul.mubr.f32.vlgmr.msra.gmra.mrb[2].mxu1 %v438_v61 }
 0x393   :  { %1622 = vmatpush3.bf16.msra.mxu1 %v1889_v11  ;;  %1384 = vmatprep.mubr.msk.f32.mxu1 %vm1816_vm0, %v1817_v24 }
 0x394   :  { %1623 = vmatprep.subr.bf16.mxu1 %v1815_v1 }
 0x397   :  { %1625 = vmatpush3.bf16.msra.mxu1 %v1895_v20 }
 0x398   :  { %1626 = vmatprep.subr.bf16.mxu1 %v1815_v1 }
 0x39b   :  { %1628 = vmatpush3.bf16.msra.mxu1 %v1901_v27 }
 0x39c   :  { %1629 = vmatprep.subr.bf16.mxu1 %v1815_v1 }
 0x39f   :  { %1631 = vmatpush3.bf16.msra.mxu1 %v1905_v33 }
 0x3a0   :  { %1632 = vmatprep.subr.bf16.mxu1 %v1815_v1 }
 0x3a3   :  { %1634 = vmatpush3.bf16.msra.mxu1 %v1909_v39 }
 0x3a4   :  { %1635 = vmatprep.subr.bf16.mxu1 %v1815_v1 }
 0x3a7   :  { %1637 = vmatpush3.bf16.msra.mxu1 %v1913_v45 }
 0x3a8   :  { %1638 = vmatprep.subr.bf16.mxu1 %v1815_v1 }
 0x3ab   :  { %1640 = vmatpush3.bf16.msra.mxu1 %v1917_v51 }
 0x3ac   :  { %1641 = vmatprep.subr.bf16.mxu1 %v1815_v1 }
 0x3af   :  { %1643 = vmatpush3.bf16.msra.mxu1 %v1921_v55 }
 0x3b0   :  { %1668 = vmatprep.subr.bf16.mxu1 %v1815_v1 }
 0x465   :  { %v507_v63 = vpop.f32.mrb[2].mxu1 }
 0x466   :  { %v511_v0 = vadd.f32 %v507_v63, %v205_v62  ;;  %v1316_v2 = vpop.f32.mrb[3].mxu1 }
 0x468   :  { %v512_v4 = vmul.f32 0.5, %v511_v0 }
 0x46a   :  { %v513_v5 = vsel %vm1984_vm8, %v511_v0, %v512_v4 }
 0x46b   :  { %1738 = vtanh.f32 %v513_v5 }
 0x475   :  { %v1739_v6 = vpop.eup %1738 }
 0x476   :  { %v515_v7 = vadd.f32 1.0, %v1739_v6 }
 0x478   :  { %v516_v9 = vmul.f32 0.5, %v515_v7 }
 0x47a   :  { %v517_v10 = vsel %vm1984_vm8, %v1739_v6, %v516_v9 }
 0x47b   :  { %520 = vrot.lane.b32.xlu1 %v517_v10, %s1819_s3  ;;  %518 = vrot.lane.b32.xlu0 %v517_v10, %s1820_s29 }
 0x47f   :  { %522 = vrot.lane.b32.xlu0 %v517_v10, %s1821_s11 }
 0x4ed   :  { %v521_v12 = vpop.permute.xlu1 %520  ;;  %v519_v13 = vpop.permute.xlu0 %518 }
 0x4ee   :  { %v525_v14 = vmul.f32 %v521_v12, %v517_v10  ;;  %v524_v15 = vmul.f32 %v519_v13, %v436_v58 }
 0x4f0   :  { %v526_v16 = vadd.f32 %v525_v14, %v524_v15  ;;  %v225_v14 = vadd.f32 %v1977_v3, %v2040_v40 }
 0x4f1   :  { %v523_v18 = vpop.permute.xlu0 %522 }
 0x4f2   :  { %1740 = vtanh.f32 %v526_v16 }
 0x4fc   :  { %v1741_v17 = vpop.eup %1740 }
 0x4fd   :  { %v528_v21 = vmul.f32 %v1741_v17, %v523_v18 }
 0x4ff   :  { %1350 = vmatmul.mubr.f32.vlgmr.msra.gmra.mrb[10].mxu0 %v528_v21 }
 0x500   :  { %1646 = vmatpush3.bf16.msra.mxu0 %v1889_v11  ;;  %1419 = vmatprep.mubr.msk.f32.mxu0 %vm1816_vm0, %v1817_v24 }
 0x501   :  { %1647 = vmatprep.subr.bf16.mxu0 %v1815_v1 }
 0x504   :  { %1649 = vmatpush3.bf16.msra.mxu0 %v1895_v20 }
 0x505   :  { %1650 = vmatprep.subr.bf16.mxu0 %v1815_v1 }
 0x508   :  { %1652 = vmatpush3.bf16.msra.mxu0 %v1901_v27 }
 0x509   :  { %1653 = vmatprep.subr.bf16.mxu0 %v1815_v1 }
 0x50c   :  { %1655 = vmatpush3.bf16.msra.mxu0 %v1905_v33 }
 0x50d   :  { %1656 = vmatprep.subr.bf16.mxu0 %v1815_v1 }
 0x510   :  { %1658 = vmatpush3.bf16.msra.mxu0 %v1909_v39 }
 0x511   :  { %1659 = vmatprep.subr.bf16.mxu0 %v1815_v1 }
 0x514   :  { %1661 = vmatpush3.bf16.msra.mxu0 %v1913_v45 }
 0x515   :  { %1662 = vmatprep.subr.bf16.mxu0 %v1815_v1 }
 0x518   :  { %1664 = vmatpush3.bf16.msra.mxu0 %v1917_v51 }
 0x519   :  { %1665 = vmatprep.subr.bf16.mxu0 %v1815_v1 }
 0x51c   :  { %1667 = vmatpush3.bf16.msra.mxu0 %v1921_v55 }
 0x51d   :  { %1692 = vmatprep.subr.bf16.mxu0 %v1815_v1 }
 0x5d2   :  { %v597_v23 = vpop.f32.mrb[10].mxu0 }
 0x5d3   :  { %v601_v25 = vadd.f32 %v597_v23, %v210_v22  ;;  %v1351_v26 = vpop.f32.mrb[11].mxu0 }
 0x5d5   :  { %v602_v28 = vmul.f32 0.5, %v601_v25 }
 0x5d7   :  { %v603_v29 = vsel %vm1984_vm8, %v601_v25, %v602_v28 }
 0x5d8   :  { %1742 = vtanh.f32 %v603_v29 }
 0x5e2   :  { %v1743_v30 = vpop.eup %1742 }
 0x5e3   :  { %v605_v31 = vadd.f32 1.0, %v1743_v30 }
 0x5e5   :  { %v606_v32 = vmul.f32 0.5, %v605_v31 }
 0x5e7   :  { %v607_v34 = vsel %vm1984_vm8, %v1743_v30, %v606_v32 }
 0x5e8   :  { %610 = vrot.lane.b32.xlu0 %v607_v34, %s1819_s3  ;;  %608 = vrot.lane.b32.xlu1 %v607_v34, %s1820_s29 }
 0x5ec   :  { %612 = vrot.lane.b32.xlu1 %v607_v34, %s1821_s11 }
 0x65a   :  { %v611_v19 = vpop.permute.xlu0 %610  ;;  %v609_v35 = vpop.permute.xlu1 %608 }
 0x65b   :  { %v615_v41 = vmul.f32 %v611_v19, %v607_v34  ;;  %v614_v42 = vmul.f32 %v609_v35, %v526_v16  ;;  %v230_v35 = vadd.f32 %v2038_v38, %v1977_v3 }
 0x65d   :  { %v616_v43 = vadd.f32 %v615_v41, %v614_v42 }
 0x65e   :  { %v613_v46 = vpop.permute.xlu1 %612 }
 0x65f   :  { %1744 = vtanh.f32 %v616_v43 }
 0x669   :  { %v1745_v44 = vpop.eup %1744 }
 0x66a   :  { %v618_v47 = vmul.f32 %v1745_v44, %v613_v46 }
 0x66c   :  { %1385 = vmatmul.mubr.f32.vlgmr.msra.gmra.mrb[4].mxu1 %v618_v47 }
 0x66d   :  { %1670 = vmatpush3.bf16.msra.mxu1 %v1889_v11  ;;  %1454 = vmatprep.mubr.msk.f32.mxu1 %vm1816_vm0, %v1817_v24 }
 0x66e   :  { %1671 = vmatprep.subr.bf16.mxu1 %v1815_v1 }
 0x671   :  { %1673 = vmatpush3.bf16.msra.mxu1 %v1895_v20 }
 0x672   :  { %1674 = vmatprep.subr.bf16.mxu1 %v1815_v1 }
 0x675   :  { %1676 = vmatpush3.bf16.msra.mxu1 %v1901_v27 }
 0x676   :  { %1677 = vmatprep.subr.bf16.mxu1 %v1815_v1 }
 0x679   :  { %1679 = vmatpush3.bf16.msra.mxu1 %v1905_v33 }
 0x67a   :  { %1680 = vmatprep.subr.bf16.mxu1 %v1815_v1 }
 0x67d   :  { %1682 = vmatpush3.bf16.msra.mxu1 %v1909_v39 }
 0x67e   :  { %1683 = vmatprep.subr.bf16.mxu1 %v1815_v1 }
 0x681   :  { %1685 = vmatpush3.bf16.msra.mxu1 %v1913_v45 }
 0x682   :  { %1686 = vmatprep.subr.bf16.mxu1 %v1815_v1 }
 0x685   :  { %1688 = vmatpush3.bf16.msra.mxu1 %v1917_v51 }
 0x686   :  { %1689 = vmatprep.subr.bf16.mxu1 %v1815_v1 }
 0x689   :  { %1691 = vmatpush3.bf16.msra.mxu1 %v1921_v55 }
 0x73f   :  { %v687_v49 = vpop.f32.mrb[4].mxu1 }
 0x740   :  { %v691_v50 = vadd.f32 %v687_v49, %v215_v48  ;;  %v1386_v52 = vpop.f32.mrb[5].mxu1 }
 0x742   :  { %v692_v53 = vmul.f32 0.5, %v691_v50 }
 0x744   :  { %v693_v54 = vsel %vm1984_vm8, %v691_v50, %v692_v53 }
 0x745   :  { %1746 = vtanh.f32 %v693_v54 }
 0x74f   :  { %v1747_v56 = vpop.eup %1746 }
 0x750   :  { %v695_v57 = vadd.f32 1.0, %v1747_v56 }
 0x752   :  { %v696_v58 = vmul.f32 0.5, %v695_v57 }
 0x754   :  { %v697_v59 = vsel %vm1984_vm8, %v1747_v56, %v696_v58 }
 0x755   :  { %700 = vrot.lane.b32.xlu1 %v697_v59, %s1819_s3  ;;  %698 = vrot.lane.b32.xlu0 %v697_v59, %s1820_s29 }
 0x759   :  { %702 = vrot.lane.b32.xlu0 %v697_v59, %s1821_s11 }
 0x7c7   :  { %v701_v37 = vpop.permute.xlu1 %700  ;;  %v699_v60 = vpop.permute.xlu0 %698 }
 0x7c8   :  { %v705_v61 = vmul.f32 %v701_v37, %v697_v59  ;;  %v704_v62 = vmul.f32 %v699_v60, %v616_v43 }
 0x7ca   :  { %v706_v63 = vadd.f32 %v705_v61, %v704_v62 }
 0x7cb   :  { %v703_v2 = vpop.permute.xlu0 %702 }
 0x7cc   :  { %1748 = vtanh.f32 %v706_v63 }
 0x7d6   :  { %v1749_v0 = vpop.eup %1748 }
 0x7d7   :  { %v708_v4 = vmul.f32 %v1749_v0, %v703_v2 }
 0x7d9   :  { %1420 = vmatmul.mubr.f32.vlgmr.msra.gmra.mrb[12].mxu0 %v708_v4 }
 0x7da   :  { %1694 = vmatpush3.bf16.msra.mxu0 %v1889_v11  ;;  %1489 = vmatprep.mubr.msk.f32.mxu0 %vm1816_vm0, %v1817_v24  ;;  %v220_v11 = vadd.f32 %v2034_v36, %v1977_v3 }
 0x7db   :  { %1695 = vmatprep.subr.bf16.mxu0 %v1815_v1 }
 0x7de   :  { %1697 = vmatpush3.bf16.msra.mxu0 %v1895_v20 }
 0x7df   :  { %1698 = vmatprep.subr.bf16.mxu0 %v1815_v1 }
 0x7e2   :  { %1700 = vmatpush3.bf16.msra.mxu0 %v1901_v27 }
 0x7e3   :  { %1701 = vmatprep.subr.bf16.mxu0 %v1815_v1 }
 0x7e6   :  { %1703 = vmatpush3.bf16.msra.mxu0 %v1905_v33 }
 0x7e7   :  { %1704 = vmatprep.subr.bf16.mxu0 %v1815_v1 }
 0x7ea   :  { %1706 = vmatpush3.bf16.msra.mxu0 %v1909_v39 }
 0x7eb   :  { %1707 = vmatprep.subr.bf16.mxu0 %v1815_v1 }
 0x7ee   :  { %1709 = vmatpush3.bf16.msra.mxu0 %v1913_v45 }
 0x7ef   :  { %1710 = vmatprep.subr.bf16.mxu0 %v1815_v1 }
 0x7f2   :  { %1712 = vmatpush3.bf16.msra.mxu0 %v1917_v51 }
 0x7f3   :  { %1713 = vmatprep.subr.bf16.mxu0 %v1815_v1 }
 0x7f6   :  { %1715 = vmatpush3.bf16.msra.mxu0 %v1921_v55 }
 0x8ac   :  { %v777_v20 = vpop.f32.mrb[12].mxu0 }
 0x8ad   :  { %v781_v24 = vadd.f32 %v777_v20, %v220_v11  ;;  %v1421_v27 = vpop.f32.mrb[13].mxu0 }
 0x8af   :  { %v782_v33 = vmul.f32 0.5, %v781_v24 }
 0x8b1   :  { %v783_v39 = vsel %vm1984_vm8, %v781_v24, %v782_v33 }
 0x8b2   :  { %1750 = vtanh.f32 %v783_v39 }
 0x8bc   :  { %v1751_v45 = vpop.eup %1750 }
 0x8bd   :  { %v785_v5 = vadd.f32 1.0, %v1751_v45 }
 0x8bf   :  { %v786_v6 = vmul.f32 0.5, %v785_v5 }
 0x8c1   :  { %v787_v51 = vsel %vm1984_vm8, %v1751_v45, %v786_v6 }
 0x8c2   :  { %790 = vrot.lane.b32.xlu0 %v787_v51, %s1819_s3  ;;  %788 = vrot.lane.b32.xlu1 %v787_v51, %s1820_s29 }
 0x8c6   :  { %792 = vrot.lane.b32.xlu1 %v787_v51, %s1821_s11 }
 0x934   :  { %v791_v1 = vpop.permute.xlu0 %790  ;;  %v789_v55 = vpop.permute.xlu1 %788 }
 0x935   :  { %v795_v36 = vmul.f32 %v791_v1, %v787_v51  ;;  %v794_v7 = vmul.f32 %v789_v55, %v706_v63 }
 0x937   :  { %v796_v9 = vadd.f32 %v795_v36, %v794_v7 }
 0x938   :  { %v793_v12 = vpop.permute.xlu1 %792 }
 0x939   :  { %1752 = vtanh.f32 %v796_v9 }
 0x943   :  { %v1753_v10 = vpop.eup %1752 }
 0x944   :  { %v798_v13 = vmul.f32 %v1753_v10, %v793_v12 }
 0x946   :  { %1455 = vmatmul.mubr.f32.vlgmr.msra.gmra.mrb[6].mxu1 %v798_v13 }
 0xa19   :  { %v867_v15 = vpop.f32.mrb[6].mxu1 }
 0xa1a   :  { %v871_v16 = vadd.f32 %v867_v15, %v225_v14  ;;  %v1456_v17 = vpop.f32.mrb[7].mxu1 }
 0xa1c   :  { %v872_v18 = vmul.f32 0.5, %v871_v16 }
 0xa1e   :  { %v873_v21 = vsel %vm1984_vm8, %v871_v16, %v872_v18 }
 0xa1f   :  { %1754 = vtanh.f32 %v873_v21 }
 0xa29   :  { %v1755_v22 = vpop.eup %1754 }
 0xa2a   :  { %v875_v23 = vadd.f32 1.0, %v1755_v22 }
 0xa2c   :  { %v876_v25 = vmul.f32 0.5, %v875_v23 }
 0xa2e   :  { %v877_v26 = vsel %vm1984_vm8, %v1755_v22, %v876_v25 }
 0xa2f   :  { %880 = vrot.lane.b32.xlu1 %v877_v26, %s1819_s3  ;;  %878 = vrot.lane.b32.xlu0 %v877_v26, %s1820_s29 }
 0xa33   :  { %882 = vrot.lane.b32.xlu0 %v877_v26, %s1821_s11 }
 0xaa1   :  { %v881_v40 = vpop.permute.xlu1 %880  ;;  %v879_v28 = vpop.permute.xlu0 %878 }
 0xaa2   :  { %v885_v29 = vmul.f32 %v881_v40, %v877_v26  ;;  %v884_v30 = vmul.f32 %v879_v28, %v796_v9 }
 0xaa4   :  { %v886_v31 = vadd.f32 %v885_v29, %v884_v30 }
 0xaa5   :  { %v883_v34 = vpop.permute.xlu0 %882 }
 0xaa6   :  { %1756 = vtanh.f32 %v886_v31 }
 0xab0   :  { %v1757_v32 = vpop.eup %1756 }
 0xab1   :  { %v888_v19 = vmul.f32 %v1757_v32, %v883_v34 }
 0xab3   :  { %1490 = vmatmul.mubr.f32.vlgmr.msra.gmra.mrb[14].mxu0 %v888_v19 }
 0xb86   :  { %v957_v41 = vpop.f32.mrb[14].mxu0 }
 0xb87   :  { %v961_v42 = vadd.f32 %v957_v41, %v230_v35  ;;  %v1491_v43 = vpop.f32.mrb[15].mxu0 }
 0xb89   :  { %v962_v44 = vmul.f32 0.5, %v961_v42 }
 0xb8b   :  { %v963_v46 = vsel %vm1984_vm8, %v961_v42, %v962_v44 }
 0xb8c   :  { %1758 = vtanh.f32 %v963_v46 }
 0xb96   :  { %v1759_v47 = vpop.eup %1758 }
 0xb97   :  { %v965_v48 = vadd.f32 1.0, %v1759_v47 }
 0xb99   :  { %v966_v49 = vmul.f32 0.5, %v965_v48 }
 0xb9b   :  { %v967_v50 = vsel %vm1984_vm8, %v1759_v47, %v966_v49 }
 0xb9c   :  { %970 = vrot.lane.b32.xlu0 %v967_v50, %s1819_s3  ;;  %968 = vrot.lane.b32.xlu1 %v967_v50, %s1820_s29 }
 0xba0   :  { %972 = vrot.lane.b32.xlu1 %v967_v50, %s1821_s11 }
 0xc0e   :  { %v971_v3 = vpop.permute.xlu0 %970  ;;  %v969_v38 = vpop.permute.xlu1 %968 }
 0xc0f   :  { %v975_v52 = vmul.f32 %v971_v3, %v967_v50  ;;  %v974_v53 = vmul.f32 %v969_v38, %v886_v31 }
 0xc11   :  { %v976_v54 = vadd.f32 %v975_v52, %v974_v53 }
 0xc12   :  { %v973_v57 = vpop.permute.xlu1 %972 }
 0xc13   :  { %1760 = vtanh.f32 %v976_v54  ;;  %980 = vst [vmem:[%s2186_s5] sm:$0xff] %v976_v54 }
 0xc1d   :  { %v1761_v56 = vpop.eup %1760 }
 0xc1e   :  { %v978_v8 = vmul.f32 %v1761_v56, %v973_v57 }
 0xc20   :  { %979 = vst [vmem:[%s2185_s4] sm:$0xff] %v978_v8 }
 0xc21   :  { %989 = vsyncpa [#allocation4], 1 }
 0xc22   :  { %990 = vsyncpa [#allocation6], 1 }

</bundles_post_ra>
